<compile_context>
chip_gen: v7x
topology: tpu7x:2x2x1
jax: 0.10.0
libtpu: 0.0.40
codegen_flags: <defaults>
</compile_context>

<pallas_src>
import functools

import jax
import jax.numpy as jnp
from jax.experimental import pallas as pl
from jax.experimental.pallas import tpu as pltpu

# ---------------- config (synthetic, small) ----------------
B = 2          # batch
T = 8          # sequence length (== block_size)
N_EMBD = 32    # embedding dim
N_HEAD = 4
HEAD_SIZE = N_EMBD // N_HEAD
LN_EPS = 1e-5
NEG_BIG = -1e30   # finite "masked" value (avoids inf-inf -> NaN hazards)


def _layer_norm(h, gamma, beta):
    mu = jnp.mean(h, axis=-1, keepdims=True)
    var = jnp.mean((h - mu) ** 2, axis=-1, keepdims=True)
    return (h - mu) * jax.lax.rsqrt(var + LN_EPS) * gamma + beta


def block_kernel(
    x_ref,            # (T, C)   one sequence of the batch
    wqkv_ref,         # (C, 3C)  fused [Wq*scale | Wk | Wv]   (matmul_dtype)
    wp_ref,           # (C, C)   attention out-projection      (matmul_dtype)
    w1_ref,           # (C, 4C)  FFN up                        (matmul_dtype)
    w2_ref,           # (4C, C)  FFN down                      (matmul_dtype)
    pvec_ref,         # (8, 4C)  packed small params (f32):
                      #   row 0: ln1 gamma   row 1: ln1 beta
                      #   row 2: ln2 gamma   row 3: ln2 beta
                      #   row 4: proj bias   row 5: ffn b2    row 6: ffn b1 (4C)
    o_ref,            # (T, C)
    heads_ref,        # (T, C) f32 VMEM scratch: concat(head outputs) slab
    *, n_head: int, matmul_dtype, approx_recip: bool,
):
    t, c = x_ref.shape
    hs = c // n_head
    dt = matmul_dtype

    pp = pvec_ref[...]
    g1, be1 = pp[0:1, :c], pp[1:2, :c]
    g2, be2 = pp[2:3, :c], pp[3:4, :c]
    bp, b2 = pp[4:5, :c], pp[5:6, :c]
    b1 = pp[6:7, :]                      # (1, 4C)

    x = x_ref[...]                       # (T, C) f32

    # ---- LayerNorm 1 (f32) + fused QKV projection; cast result ONCE ----
    xn = _layer_norm(x, g1, be1)
    qkv = jnp.dot(xn.astype(dt), wqkv_ref[...],
                  preferred_element_type=jnp.float32).astype(dt)   # (T, 3C)

    # ---- causal mask built in-kernel (no O(T^2) HBM input) ----
    row = jax.lax.broadcasted_iota(jnp.int32, (t, t), 0)
    col = jax.lax.broadcasted_iota(jnp.int32, (t, t), 1)
    bias = jnp.where(row >= col, 0.0, NEG_BIG).astype(jnp.float32)

    # ---- multi-head causal self-attention (softmax kept in f32) ----
    # Head outputs go into the (T, C) slab so the output projection is a
    # single K=C matmul after the loop (== concat(heads) @ Wp).
    # TODO(synk): check via pl.lower_as_mlir whether the NT score dot_general
    # emits a per-head vxpose at real sizes; if so pre-transpose K once.
    for h in range(n_head):              # static unrolled; n_head is small
        q_h = qkv[:, h * hs:(h + 1) * hs]
        k_h = qkv[:, c + h * hs: c + (h + 1) * hs]
        v_h = qkv[:, 2 * c + h * hs: 2 * c + (h + 1) * hs]

        # scale already folded into Wq; NT matmul (contract head dim)
        s = jax.lax.dot_general(
            q_h, k_h,
            dimension_numbers=(((1,), (1,)), ((), ())),
            preferred_element_type=jnp.float32)                     # (T, T)
        s = s + bias
        s = s - jnp.max(s, axis=-1, keepdims=True)
        p = jnp.exp(s)
        p = p * pl.reciprocal(jnp.sum(p, axis=-1, keepdims=True),
                              approx=approx_recip)

        o_h = jnp.dot(p.astype(dt), v_h,
                      preferred_element_type=jnp.float32)           # (T, hs)
        heads_ref[:, h * hs:(h + 1) * hs] = o_h

    sa = jnp.dot(heads_ref[...].astype(dt), wp_ref[...],
                 preferred_element_type=jnp.float32) + bp           # (T, C)
    x1 = x + sa                                                     # residual 1

    # ---- LayerNorm 2 (f32) + FeedForward ----
    xn2 = _layer_norm(x1, g2, be2)
    hff = jnp.maximum(
        jnp.dot(xn2.astype(dt), w1_ref[...],
                preferred_element_type=jnp.float32) + b1, 0.0)
    ff = jnp.dot(hff.astype(dt), w2_ref[...],
                 preferred_element_type=jnp.float32) + b2

    o_ref[...] = (x1 + ff).astype(o_ref.dtype)                      # residual 2


def transformer_block(x, params, *, n_head=N_HEAD, matmul_dtype=jnp.bfloat16):
    (wq, wk, wv, wp, bp, w1, b1, w2, b2, g1, be1, g2, be2) = params
    b, t, c = x.shape

    # Fold the attention scale into Wq and fuse QKV; cast MXU weights.
    scale = c ** (-0.5)              # full-C scale, as in the reference module
    wqkv = jnp.concatenate([wq * scale, wk, wv], axis=1).astype(matmul_dtype)
    wp_c = wp.astype(matmul_dtype)
    w1_c = w1.astype(matmul_dtype)
    w2_c = w2.astype(matmul_dtype)

    # Pack the seven small params into ONE (8, 4C) f32 input (one tile / DMA).
    pvec = jnp.zeros((8, 4 * c), jnp.float32)
    pvec = pvec.at[0, :c].set(g1[0]).at[1, :c].set(be1[0])
    pvec = pvec.at[2, :c].set(g2[0]).at[3, :c].set(be2[0])
    pvec = pvec.at[4, :c].set(bp[0]).at[5, :c].set(b2[0])
    pvec = pvec.at[6, :].set(b1[0])

    x2 = x.reshape(b * t, c)         # free wrapper-level reshape

    res = lambda shape: pl.BlockSpec(shape, lambda i: (0,) * len(shape))
    kernel = functools.partial(
        block_kernel, n_head=n_head, matmul_dtype=matmul_dtype,
        approx_recip=(matmul_dtype != jnp.float32))

    out = pl.pallas_call(
        kernel,
        out_shape=jax.ShapeDtypeStruct((b * t, c), x.dtype),
        grid=(b,),                                   # >=2 parallel steps
        in_specs=[
            pl.BlockSpec((t, c), lambda i: (i, 0)),  # this batch's rows
            res((c, 3 * c)),                         # fused Wqkv (resident)
            res((c, c)),                             # Wproj
            res((c, 4 * c)),                         # W1
            res((4 * c, c)),                         # W2
            res((8, 4 * c)),                         # packed small params
        ],
        out_specs=pl.BlockSpec((t, c), lambda i: (i, 0)),
        scratch_shapes=[pltpu.VMEM((t, c), jnp.float32)],   # head-output slab
        compiler_params=pltpu.CompilerParams(
            dimension_semantics=("parallel",),
            vmem_limit_bytes=32 * 1024 * 1024),
    )(x2, wqkv, wp_c, w1_c, w2_c, pvec)
    return out.reshape(b, t, c)


# ---------------- pure-JAX reference (for verification) ----------------
def reference_block(x, params, *, n_head=N_HEAD):
    (wq, wk, wv, wp, bp, w1, b1, w2, b2, g1, be1, g2, be2) = params
    b_, t, c = x.shape
    hs = c // n_head
    xn = _layer_norm(x, g1[0], be1[0])
    q = xn @ wq
    k = xn @ wk
    v = xn @ wv
    mask = jnp.tril(jnp.ones((t, t), bool))
    outs = []
    for h in range(n_head):
        qh = q[..., h * hs:(h + 1) * hs]
        kh = k[..., h * hs:(h + 1) * hs]
        vh = v[..., h * hs:(h + 1) * hs]
        s = jnp.einsum("btd,bsd->bts", qh, kh) * c ** (-0.5)
        s = jnp.where(mask, s, -jnp.inf)
        p = jax.nn.softmax(s, axis=-1)
        outs.append(jnp.einsum("bts,bsd->btd", p, vh))
    att = jnp.concatenate(outs, axis=-1)
    x1 = x + att @ wp + bp[0]
    xn2 = _layer_norm(x1, g2[0], be2[0])
    ff = jnp.maximum(xn2 @ w1 + b1[0], 0.0) @ w2 + b2[0]
    return x1 + ff


def init_params(key, c=N_EMBD):
    ks = jax.random.split(key, 9)
    s = 0.08
    wq = jax.random.normal(ks[0], (c, c), jnp.float32) * s
    wk = jax.random.normal(ks[1], (c, c), jnp.float32) * s
    wv = jax.random.normal(ks[2], (c, c), jnp.float32) * s
    wp = jax.random.normal(ks[3], (c, c), jnp.float32) * s
    bp = jax.random.normal(ks[4], (1, c), jnp.float32) * s
    w1 = jax.random.normal(ks[5], (c, 4 * c), jnp.float32) * s
    b1 = jax.random.normal(ks[6], (1, 4 * c), jnp.float32) * s
    w2 = jax.random.normal(ks[7], (4 * c, c), jnp.float32) * s
    b2 = jax.random.normal(ks[8], (1, c), jnp.float32) * s
    g1 = jnp.ones((1, c), jnp.float32)
    be1 = jnp.zeros((1, c), jnp.float32)
    g2 = jnp.ones((1, c), jnp.float32)
    be2 = jnp.zeros((1, c), jnp.float32)
    return (wq, wk, wv, wp, bp, w1, b1, w2, b2, g1, be1, g2, be2)


if __name__ == "__main__":
    key = jax.random.PRNGKey(0)
    kx, kp = jax.random.split(key)
    x = jax.random.normal(kx, (B, T, N_EMBD), jnp.float32)
    params = init_params(kp)

    ref = reference_block(x, params)

    # Exact-semantics path (f32 MXU inputs, exact reciprocal): matches PyTorch-f32.
    out_f32 = jax.block_until_ready(
        transformer_block(x, params, matmul_dtype=jnp.float32))
    assert out_f32.shape == (B, T, N_EMBD)
    assert jnp.allclose(out_f32, ref, atol=1e-4, rtol=1e-4), "f32 mismatch"

    # Default fast path (bf16 MXU inputs, f32 accumulate / LN / softmax,
    # approx reciprocal on the EUP).
    out_bf16 = jax.block_until_ready(transformer_block(x, params))
    assert out_bf16.shape == (B, T, N_EMBD)
    assert jnp.allclose(out_bf16, ref, atol=3e-2, rtol=3e-2), "bf16 mismatch"

    print("KERNEL_OK")
</pallas_src>

<mosaic_0001>
module attributes {stable_mosaic.version = 11 : i64} {
  func.func @block_kernel(%arg0: i32, %arg1: memref<8x32xf32, #tpu.memory_space<vmem>>, %arg2: memref<32x96xf32, #tpu.memory_space<vmem>>, %arg3: memref<32x32xf32, #tpu.memory_space<vmem>>, %arg4: memref<32x128xf32, #tpu.memory_space<vmem>>, %arg5: memref<128x32xf32, #tpu.memory_space<vmem>>, %arg6: memref<8x128xf32, #tpu.memory_space<vmem>>, %arg7: memref<8x32xf32, #tpu.memory_space<vmem>>, %arg8: memref<8x32xf32, #tpu.memory_space<vmem>>) attributes {dimension_semantics = [#tpu.dimension_semantics<parallel>], iteration_bounds = array<i64: 2>, scalar_prefetch = 0 : i64, scratch_operands = 1 : i64, tpu.core_type = #tpu.core_type<tc>, window_params = [{transform_indices = @transform_0, window_bounds = array<i64: 8, 32>}, {pipeline_mode = #tpu.pipeline_mode<synchronous>, transform_indices = @transform_1, window_bounds = array<i64: 32, 96>}, {pipeline_mode = #tpu.pipeline_mode<synchronous>, transform_indices = @transform_2, window_bounds = array<i64: 32, 32>}, {pipeline_mode = #tpu.pipeline_mode<synchronous>, transform_indices = @transform_3, window_bounds = array<i64: 32, 128>}, {pipeline_mode = #tpu.pipeline_mode<synchronous>, transform_indices = @transform_4, window_bounds = array<i64: 128, 32>}, {pipeline_mode = #tpu.pipeline_mode<synchronous>, transform_indices = @transform_5, window_bounds = array<i64: 8, 128>}, {transform_indices = @transform_6, window_bounds = array<i64: 8, 32>}]} {
    %c0 = arith.constant 0 : index
    %c0_0 = arith.constant 0 : index
    %0 = vector.load %arg6[%c0, %c0_0] : memref<8x128xf32, #tpu.memory_space<vmem>>, vector<8x128xf32>
    %1 = vector.extract_strided_slice %0 {offsets = [0, 0], sizes = [1, 32], strides = [1, 1]} : vector<8x128xf32> to vector<1x32xf32>
    %2 = vector.extract_strided_slice %0 {offsets = [1, 0], sizes = [1, 32], strides = [1, 1]} : vector<8x128xf32> to vector<1x32xf32>
    %3 = vector.extract_strided_slice %0 {offsets = [2, 0], sizes = [1, 32], strides = [1, 1]} : vector<8x128xf32> to vector<1x32xf32>
    %4 = vector.extract_strided_slice %0 {offsets = [3, 0], sizes = [1, 32], strides = [1, 1]} : vector<8x128xf32> to vector<1x32xf32>
    %5 = vector.extract_strided_slice %0 {offsets = [4, 0], sizes = [1, 32], strides = [1, 1]} : vector<8x128xf32> to vector<1x32xf32>
    %6 = vector.extract_strided_slice %0 {offsets = [5, 0], sizes = [1, 32], strides = [1, 1]} : vector<8x128xf32> to vector<1x32xf32>
    %7 = vector.extract_strided_slice %0 {offsets = [6, 0], sizes = [1, 128], strides = [1, 1]} : vector<8x128xf32> to vector<1x128xf32>
    %c0_1 = arith.constant 0 : index
    %c0_2 = arith.constant 0 : index
    %8 = vector.load %arg1[%c0_1, %c0_2] : memref<8x32xf32, #tpu.memory_space<vmem>>, vector<8x32xf32>
    %cst = arith.constant dense<0.000000e+00> : vector<8xf32>
    %9 = vector.multi_reduction <add>, %8, %cst [1] : vector<8x32xf32> to vector<8xf32>
    %10 = vector.shape_cast %9 : vector<8xf32> to vector<8x1xf32>
    %cst_3 = arith.constant 3.200000e+01 : f32
    %11 = vector.broadcast %cst_3 : f32 to vector<8x1xf32>
    %12 = arith.divf %10, %11 : vector<8x1xf32>
    %13 = vector.broadcast %12 : vector<8x1xf32> to vector<8x32xf32>
    %14 = arith.subf %8, %13 : vector<8x32xf32>
    %15 = arith.mulf %14, %14 : vector<8x32xf32>
    %cst_4 = arith.constant dense<0.000000e+00> : vector<8xf32>
    %16 = vector.multi_reduction <add>, %15, %cst_4 [1] : vector<8x32xf32> to vector<8xf32>
    %17 = vector.shape_cast %16 : vector<8xf32> to vector<8x1xf32>
    %cst_5 = arith.constant 3.200000e+01 : f32
    %18 = vector.broadcast %cst_5 : f32 to vector<8x1xf32>
    %19 = arith.divf %17, %18 : vector<8x1xf32>
    %20 = vector.broadcast %12 : vector<8x1xf32> to vector<8x32xf32>
    %21 = arith.subf %8, %20 : vector<8x32xf32>
    %cst_6 = arith.constant 9.99999974E-6 : f32
    %22 = vector.broadcast %cst_6 : f32 to vector<8x1xf32>
    %23 = arith.addf %19, %22 : vector<8x1xf32>
    %24 = math.rsqrt %23 : vector<8x1xf32>
    %25 = vector.broadcast %24 : vector<8x1xf32> to vector<8x32xf32>
    %26 = arith.mulf %21, %25 : vector<8x32xf32>
    %27 = vector.broadcast %1 : vector<1x32xf32> to vector<8x32xf32>
    %28 = arith.mulf %26, %27 : vector<8x32xf32>
    %29 = vector.broadcast %2 : vector<1x32xf32> to vector<8x32xf32>
    %30 = arith.addf %28, %29 : vector<8x32xf32>
    %c0_7 = arith.constant 0 : index
    %c0_8 = arith.constant 0 : index
    %31 = vector.load %arg2[%c0_7, %c0_8] : memref<32x96xf32, #tpu.memory_space<vmem>>, vector<32x96xf32>
    %cst_9 = arith.constant dense<0.000000e+00> : vector<8x96xf32>
    %32 = tpu.matmul %30, %31, %cst_9 {dimension_numbers = #tpu.dot_dimension_numbers<[1], [0], [0], [1], [0, 0, 1, 1], [], []>} : vector<8x32xf32>, vector<32x96xf32>, vector<8x96xf32> -> vector<8x96xf32>
    %33 = tpu.iota {dimensions = array<i32: 0>} : vector<8x8xi32>
    %34 = tpu.iota {dimensions = array<i32: 1>} : vector<8x8xi32>
    %35 = arith.cmpi sge, %33, %34 : vector<8x8xi32>
    %cst_10 = arith.constant 0.000000e+00 : f32
    %cst_11 = arith.constant -1.000000e+30 : f32
    %36 = vector.broadcast %cst_10 : f32 to vector<8x8xf32>
    %37 = vector.broadcast %cst_11 : f32 to vector<8x8xf32>
    %38 = arith.select %35, %36, %37 : vector<8x8xi1>, vector<8x8xf32>
    %39 = vector.extract_strided_slice %32 {offsets = [0, 0], sizes = [8, 8], strides = [1, 1]} : vector<8x96xf32> to vector<8x8xf32>
    %40 = vector.extract_strided_slice %32 {offsets = [0, 32], sizes = [8, 8], strides = [1, 1]} : vector<8x96xf32> to vector<8x8xf32>
    %41 = vector.extract_strided_slice %32 {offsets = [0, 64], sizes = [8, 8], strides = [1, 1]} : vector<8x96xf32> to vector<8x8xf32>
    %cst_12 = arith.constant dense<0.000000e+00> : vector<8x8xf32>
    %42 = tpu.matmul %39, %40, %cst_12 {dimension_numbers = #tpu.dot_dimension_numbers<[1], [1], [0], [0], [0, 0, 1, 0], [], []>} : vector<8x8xf32>, vector<8x8xf32>, vector<8x8xf32> -> vector<8x8xf32>
    %43 = arith.addf %42, %38 : vector<8x8xf32>
    %cst_13 = arith.constant dense<0xFF800000> : vector<8xf32>
    %44 = vector.multi_reduction <maximumf>, %43, %cst_13 [1] : vector<8x8xf32> to vector<8xf32>
    %45 = vector.shape_cast %44 : vector<8xf32> to vector<8x1xf32>
    %46 = vector.broadcast %45 : vector<8x1xf32> to vector<8x8xf32>
    %47 = arith.subf %43, %46 : vector<8x8xf32>
    %48 = math.exp %47 : vector<8x8xf32>
    %cst_14 = arith.constant dense<0.000000e+00> : vector<8xf32>
    %49 = vector.multi_reduction <add>, %48, %cst_14 [1] : vector<8x8xf32> to vector<8xf32>
    %50 = vector.shape_cast %49 : vector<8xf32> to vector<8x1xf32>
    %51 = tpu.reciprocal %50 : vector<8x1xf32> -> vector<8x1xf32>
    %52 = vector.broadcast %51 : vector<8x1xf32> to vector<8x8xf32>
    %53 = arith.mulf %48, %52 : vector<8x8xf32>
    %cst_15 = arith.constant dense<0.000000e+00> : vector<8x8xf32>
    %54 = tpu.matmul %53, %41, %cst_15 {dimension_numbers = #tpu.dot_dimension_numbers<[1], [0], [0], [1], [0, 0, 1, 1], [], []>} : vector<8x8xf32>, vector<8x8xf32>, vector<8x8xf32> -> vector<8x8xf32>
    %c0_16 = arith.constant 0 : index
    %c0_17 = arith.constant 0 : index
    %55 = vector.load %arg8[%c0_16, %c0_17] : memref<8x32xf32, #tpu.memory_space<vmem>>, vector<8x8xf32>
    tpu.vector_store %arg8[%c0_16, %c0_17], %54 {strides = array<i32>} : memref<8x32xf32, #tpu.memory_space<vmem>>, vector<8x8xf32>,
    %56 = vector.extract_strided_slice %32 {offsets = [0, 8], sizes = [8, 8], strides = [1, 1]} : vector<8x96xf32> to vector<8x8xf32>
    %57 = vector.extract_strided_slice %32 {offsets = [0, 40], sizes = [8, 8], strides = [1, 1]} : vector<8x96xf32> to vector<8x8xf32>
    %58 = vector.extract_strided_slice %32 {offsets = [0, 72], sizes = [8, 8], strides = [1, 1]} : vector<8x96xf32> to vector<8x8xf32>
    %cst_18 = arith.constant dense<0.000000e+00> : vector<8x8xf32>
    %59 = tpu.matmul %56, %57, %cst_18 {dimension_numbers = #tpu.dot_dimension_numbers<[1], [1], [0], [0], [0, 0, 1, 0], [], []>} : vector<8x8xf32>, vector<8x8xf32>, vector<8x8xf32> -> vector<8x8xf32>
    %60 = arith.addf %59, %38 : vector<8x8xf32>
    %cst_19 = arith.constant dense<0xFF800000> : vector<8xf32>
    %61 = vector.multi_reduction <maximumf>, %60, %cst_19 [1] : vector<8x8xf32> to vector<8xf32>
    %62 = vector.shape_cast %61 : vector<8xf32> to vector<8x1xf32>
    %63 = vector.broadcast %62 : vector<8x1xf32> to vector<8x8xf32>
    %64 = arith.subf %60, %63 : vector<8x8xf32>
    %65 = math.exp %64 : vector<8x8xf32>
    %cst_20 = arith.constant dense<0.000000e+00> : vector<8xf32>
    %66 = vector.multi_reduction <add>, %65, %cst_20 [1] : vector<8x8xf32> to vector<8xf32>
    %67 = vector.shape_cast %66 : vector<8xf32> to vector<8x1xf32>
    %68 = tpu.reciprocal %67 : vector<8x1xf32> -> vector<8x1xf32>
    %69 = vector.broadcast %68 : vector<8x1xf32> to vector<8x8xf32>
    %70 = arith.mulf %65, %69 : vector<8x8xf32>
    %cst_21 = arith.constant dense<0.000000e+00> : vector<8x8xf32>
    %71 = tpu.matmul %70, %58, %cst_21 {dimension_numbers = #tpu.dot_dimension_numbers<[1], [0], [0], [1], [0, 0, 1, 1], [], []>} : vector<8x8xf32>, vector<8x8xf32>, vector<8x8xf32> -> vector<8x8xf32>
    %c0_22 = arith.constant 0 : index
    %c8 = arith.constant 8 : index
    %72 = vector.load %arg8[%c0_22, %c8] : memref<8x32xf32, #tpu.memory_space<vmem>>, vector<8x8xf32>
    tpu.vector_store %arg8[%c0_22, %c8], %71 {strides = array<i32>} : memref<8x32xf32, #tpu.memory_space<vmem>>, vector<8x8xf32>,
    %73 = vector.extract_strided_slice %32 {offsets = [0, 16], sizes = [8, 8], strides = [1, 1]} : vector<8x96xf32> to vector<8x8xf32>
    %74 = vector.extract_strided_slice %32 {offsets = [0, 48], sizes = [8, 8], strides = [1, 1]} : vector<8x96xf32> to vector<8x8xf32>
    %75 = vector.extract_strided_slice %32 {offsets = [0, 80], sizes = [8, 8], strides = [1, 1]} : vector<8x96xf32> to vector<8x8xf32>
    %cst_23 = arith.constant dense<0.000000e+00> : vector<8x8xf32>
    %76 = tpu.matmul %73, %74, %cst_23 {dimension_numbers = #tpu.dot_dimension_numbers<[1], [1], [0], [0], [0, 0, 1, 0], [], []>} : vector<8x8xf32>, vector<8x8xf32>, vector<8x8xf32> -> vector<8x8xf32>
    %77 = arith.addf %76, %38 : vector<8x8xf32>
    %cst_24 = arith.constant dense<0xFF800000> : vector<8xf32>
    %78 = vector.multi_reduction <maximumf>, %77, %cst_24 [1] : vector<8x8xf32> to vector<8xf32>
    %79 = vector.shape_cast %78 : vector<8xf32> to vector<8x1xf32>
    %80 = vector.broadcast %79 : vector<8x1xf32> to vector<8x8xf32>
    %81 = arith.subf %77, %80 : vector<8x8xf32>
    %82 = math.exp %81 : vector<8x8xf32>
    %cst_25 = arith.constant dense<0.000000e+00> : vector<8xf32>
    %83 = vector.multi_reduction <add>, %82, %cst_25 [1] : vector<8x8xf32> to vector<8xf32>
    %84 = vector.shape_cast %83 : vector<8xf32> to vector<8x1xf32>
    %85 = tpu.reciprocal %84 : vector<8x1xf32> -> vector<8x1xf32>
    %86 = vector.broadcast %85 : vector<8x1xf32> to vector<8x8xf32>
    %87 = arith.mulf %82, %86 : vector<8x8xf32>
    %cst_26 = arith.constant dense<0.000000e+00> : vector<8x8xf32>
    %88 = tpu.matmul %87, %75, %cst_26 {dimension_numbers = #tpu.dot_dimension_numbers<[1], [0], [0], [1], [0, 0, 1, 1], [], []>} : vector<8x8xf32>, vector<8x8xf32>, vector<8x8xf32> -> vector<8x8xf32>
    %c0_27 = arith.constant 0 : index
    %c16 = arith.constant 16 : index
    %89 = vector.load %arg8[%c0_27, %c16] : memref<8x32xf32, #tpu.memory_space<vmem>>, vector<8x8xf32>
    tpu.vector_store %arg8[%c0_27, %c16], %88 {strides = array<i32>} : memref<8x32xf32, #tpu.memory_space<vmem>>, vector<8x8xf32>,
    %90 = vector.extract_strided_slice %32 {offsets = [0, 24], sizes = [8, 8], strides = [1, 1]} : vector<8x96xf32> to vector<8x8xf32>
    %91 = vector.extract_strided_slice %32 {offsets = [0, 56], sizes = [8, 8], strides = [1, 1]} : vector<8x96xf32> to vector<8x8xf32>
    %92 = vector.extract_strided_slice %32 {offsets = [0, 88], sizes = [8, 8], strides = [1, 1]} : vector<8x96xf32> to vector<8x8xf32>
    %cst_28 = arith.constant dense<0.000000e+00> : vector<8x8xf32>
    %93 = tpu.matmul %90, %91, %cst_28 {dimension_numbers = #tpu.dot_dimension_numbers<[1], [1], [0], [0], [0, 0, 1, 0], [], []>} : vector<8x8xf32>, vector<8x8xf32>, vector<8x8xf32> -> vector<8x8xf32>
    %94 = arith.addf %93, %38 : vector<8x8xf32>
    %cst_29 = arith.constant dense<0xFF800000> : vector<8xf32>
    %95 = vector.multi_reduction <maximumf>, %94, %cst_29 [1] : vector<8x8xf32> to vector<8xf32>
    %96 = vector.shape_cast %95 : vector<8xf32> to vector<8x1xf32>
    %97 = vector.broadcast %96 : vector<8x1xf32> to vector<8x8xf32>
    %98 = arith.subf %94, %97 : vector<8x8xf32>
    %99 = math.exp %98 : vector<8x8xf32>
    %cst_30 = arith.constant dense<0.000000e+00> : vector<8xf32>
    %100 = vector.multi_reduction <add>, %99, %cst_30 [1] : vector<8x8xf32> to vector<8xf32>
    %101 = vector.shape_cast %100 : vector<8xf32> to vector<8x1xf32>
    %102 = tpu.reciprocal %101 : vector<8x1xf32> -> vector<8x1xf32>
    %103 = vector.broadcast %102 : vector<8x1xf32> to vector<8x8xf32>
    %104 = arith.mulf %99, %103 : vector<8x8xf32>
    %cst_31 = arith.constant dense<0.000000e+00> : vector<8x8xf32>
    %105 = tpu.matmul %104, %92, %cst_31 {dimension_numbers = #tpu.dot_dimension_numbers<[1], [0], [0], [1], [0, 0, 1, 1], [], []>} : vector<8x8xf32>, vector<8x8xf32>, vector<8x8xf32> -> vector<8x8xf32>
    %c0_32 = arith.constant 0 : index
    %c24 = arith.constant 24 : index
    %106 = vector.load %arg8[%c0_32, %c24] : memref<8x32xf32, #tpu.memory_space<vmem>>, vector<8x8xf32>
    tpu.vector_store %arg8[%c0_32, %c24], %105 {strides = array<i32>} : memref<8x32xf32, #tpu.memory_space<vmem>>, vector<8x8xf32>,
    %c0_33 = arith.constant 0 : index
    %c0_34 = arith.constant 0 : index
    %107 = vector.load %arg8[%c0_33, %c0_34] : memref<8x32xf32, #tpu.memory_space<vmem>>, vector<8x32xf32>
    %c0_35 = arith.constant 0 : index
    %c0_36 = arith.constant 0 : index
    %108 = vector.load %arg3[%c0_35, %c0_36] : memref<32x32xf32, #tpu.memory_space<vmem>>, vector<32x32xf32>
    %cst_37 = arith.constant dense<0.000000e+00> : vector<8x32xf32>
    %109 = tpu.matmul %107, %108, %cst_37 {dimension_numbers = #tpu.dot_dimension_numbers<[1], [0], [0], [1], [0, 0, 1, 1], [], []>} : vector<8x32xf32>, vector<32x32xf32>, vector<8x32xf32> -> vector<8x32xf32>
    %110 = vector.broadcast %5 : vector<1x32xf32> to vector<8x32xf32>
    %111 = arith.addf %109, %110 : vector<8x32xf32>
    %112 = arith.addf %8, %111 : vector<8x32xf32>
    %cst_38 = arith.constant dense<0.000000e+00> : vector<8xf32>
    %113 = vector.multi_reduction <add>, %112, %cst_38 [1] : vector<8x32xf32> to vector<8xf32>
    %114 = vector.shape_cast %113 : vector<8xf32> to vector<8x1xf32>
    %cst_39 = arith.constant 3.200000e+01 : f32
    %115 = vector.broadcast %cst_39 : f32 to vector<8x1xf32>
    %116 = arith.divf %114, %115 : vector<8x1xf32>
    %117 = vector.broadcast %116 : vector<8x1xf32> to vector<8x32xf32>
    %118 = arith.subf %112, %117 : vector<8x32xf32>
    %119 = arith.mulf %118, %118 : vector<8x32xf32>
    %cst_40 = arith.constant dense<0.000000e+00> : vector<8xf32>
    %120 = vector.multi_reduction <add>, %119, %cst_40 [1] : vector<8x32xf32> to vector<8xf32>
    %121 = vector.shape_cast %120 : vector<8xf32> to vector<8x1xf32>
    %cst_41 = arith.constant 3.200000e+01 : f32
    %122 = vector.broadcast %cst_41 : f32 to vector<8x1xf32>
    %123 = arith.divf %121, %122 : vector<8x1xf32>
    %124 = vector.broadcast %116 : vector<8x1xf32> to vector<8x32xf32>
    %125 = arith.subf %112, %124 : vector<8x32xf32>
    %cst_42 = arith.constant 9.99999974E-6 : f32
    %126 = vector.broadcast %cst_42 : f32 to vector<8x1xf32>
    %127 = arith.addf %123, %126 : vector<8x1xf32>
    %128 = math.rsqrt %127 : vector<8x1xf32>
    %129 = vector.broadcast %128 : vector<8x1xf32> to vector<8x32xf32>
    %130 = arith.mulf %125, %129 : vector<8x32xf32>
    %131 = vector.broadcast %3 : vector<1x32xf32> to vector<8x32xf32>
    %132 = arith.mulf %130, %131 : vector<8x32xf32>
    %133 = vector.broadcast %4 : vector<1x32xf32> to vector<8x32xf32>
    %134 = arith.addf %132, %133 : vector<8x32xf32>
    %c0_43 = arith.constant 0 : index
    %c0_44 = arith.constant 0 : index
    %135 = vector.load %arg4[%c0_43, %c0_44] : memref<32x128xf32, #tpu.memory_space<vmem>>, vector<32x128xf32>
    %cst_45 = arith.constant dense<0.000000e+00> : vector<8x128xf32>
    %136 = tpu.matmul %134, %135, %cst_45 {dimension_numbers = #tpu.dot_dimension_numbers<[1], [0], [0], [1], [0, 0, 1, 1], [], []>} : vector<8x32xf32>, vector<32x128xf32>, vector<8x128xf32> -> vector<8x128xf32>
    %137 = vector.broadcast %7 : vector<1x128xf32> to vector<8x128xf32>
    %138 = arith.addf %136, %137 : vector<8x128xf32>
    %cst_46 = arith.constant 0.000000e+00 : f32
    %139 = vector.broadcast %cst_46 : f32 to vector<8x128xf32>
    %140 = arith.maximumf %138, %139 : vector<8x128xf32>
    %c0_47 = arith.constant 0 : index
    %c0_48 = arith.constant 0 : index
    %141 = vector.load %arg5[%c0_47, %c0_48] : memref<128x32xf32, #tpu.memory_space<vmem>>, vector<128x32xf32>
    %cst_49 = arith.constant dense<0.000000e+00> : vector<8x32xf32>
    %142 = tpu.matmul %140, %141, %cst_49 {dimension_numbers = #tpu.dot_dimension_numbers<[1], [0], [0], [1], [0, 0, 1, 1], [], []>} : vector<8x128xf32>, vector<128x32xf32>, vector<8x32xf32> -> vector<8x32xf32>
    %143 = vector.broadcast %6 : vector<1x32xf32> to vector<8x32xf32>
    %144 = arith.addf %142, %143 : vector<8x32xf32>
    %145 = arith.addf %112, %144 : vector<8x32xf32>
    %c0_50 = arith.constant 0 : index
    %c0_51 = arith.constant 0 : index
    %146 = vector.load %arg7[%c0_50, %c0_51] : memref<8x32xf32, #tpu.memory_space<vmem>>, vector<8x32xf32>
    tpu.vector_store %arg7[%c0_50, %c0_51], %145 {strides = array<i32>} : memref<8x32xf32, #tpu.memory_space<vmem>>, vector<8x32xf32>,
    return
  }
  func.func @transform_0(%arg0: i32) -> (i32, i32) {
    %c0_i32 = arith.constant 0 : i32
    %c0_i32_0 = arith.constant 0 : i32
    return %arg0, %c0_i32 : i32, i32
  }
  func.func @transform_1(%arg0: i32) -> (i32, i32) {
    %c0_i32 = arith.constant 0 : i32
    %c0_i32_0 = arith.constant 0 : i32
    %c0_i32_1 = arith.constant 0 : i32
    return %c0_i32, %c0_i32_0 : i32, i32
  }
  func.func @transform_2(%arg0: i32) -> (i32, i32) {
    %c0_i32 = arith.constant 0 : i32
    %c0_i32_0 = arith.constant 0 : i32
    %c0_i32_1 = arith.constant 0 : i32
    return %c0_i32, %c0_i32_0 : i32, i32
  }
  func.func @transform_3(%arg0: i32) -> (i32, i32) {
    %c0_i32 = arith.constant 0 : i32
    %c0_i32_0 = arith.constant 0 : i32
    %c0_i32_1 = arith.constant 0 : i32
    return %c0_i32, %c0_i32_0 : i32, i32
  }
  func.func @transform_4(%arg0: i32) -> (i32, i32) {
    %c0_i32 = arith.constant 0 : i32
    %c0_i32_0 = arith.constant 0 : i32
    %c0_i32_1 = arith.constant 0 : i32
    return %c0_i32, %c0_i32_0 : i32, i32
  }
  func.func @transform_5(%arg0: i32) -> (i32, i32) {
    %c0_i32 = arith.constant 0 : i32
    %c0_i32_0 = arith.constant 0 : i32
    %c0_i32_1 = arith.constant 0 : i32
    return %c0_i32, %c0_i32_0 : i32, i32
  }
  func.func @transform_6(%arg0: i32) -> (i32, i32) {
    %c0_i32 = arith.constant 0 : i32
    %c0_i32_0 = arith.constant 0 : i32
    return %arg0, %c0_i32 : i32, i32
  }
}

</mosaic_0001>

<bundles_post_ra>
// kernel: tpu_custom_call.1
= control target key start
LH: loop header
LB: loop body
LE: loop exit
PB: predicated region body
PF: predicated region fallthrough
CT: control target
= control target key end

     0   :  { %11 = vsyncpa [#allocation4], 0  ;;  %s2112_s0 = inlined_call_operand.vmem [shape: f32[16,32], index: 0, kind: input, shape index: {}]   ;;  %s2113_s1 = inlined_call_operand.vmem [shape: f32[32,96], index: 1, kind: input, shape index: {}]   ;;  %s2114_s2 = inlined_call_operand.vmem [shape: f32[32,32], index: 2, kind: input, shape index: {}]   ;;  %s2115_s3 = inlined_call_operand.vmem [shape: f32[32,128], index: 3, kind: input, shape index: {}]   ;;  %s2116_s4 = inlined_call_operand.vmem [shape: f32[128,32], index: 4, kind: input, shape index: {}]   ;;  %s2117_s5 = inlined_call_operand.vmem [shape: f32[8,128], index: 5, kind: input, shape index: {}]   ;;  %s2118_s6 = inlined_call_operand.hbm [shape: f32[16,32], index: 6, kind: output, shape index: {}]  }
   0x1   :  { %13 = vsyncpa [#allocation4 + $0x1], 0  ;;  %s1807_s21 = smov 0   ;;  %s1809_s22 = smov 0  }
   0x2   :  { %s1811_s23 = smov 0   ;;  %s1813_s24 = smov 0  }
   0x3 LB: > { %s1828_s25 = sadd.s32 4294967295, %s1751_s24   ;;  %s1389_s26 = sadd.s32 4294967294, %s1751_s24   ;;  %s1751_s24 = sphi %s1813_s24, %s2124_s24   ;;  %s1747_s23 = sphi %s1811_s23, %s2123_s23   ;;  %s1743_s22 = sphi %s1809_s22, %s2122_s22   ;;  %s1739_s21 = sphi %s1807_s21, %s2121_s21  }
   0x4   : > { %s1832_s27 = sadd.s32 1, %s1751_s24   ;;  %s157_s28 = sadd.s32 1, %s1747_s23 }
   0x5   : > { %s154_s29 = ssub.s32 %s1751_s24, %s1832_s27  ;;  %p167_p0 = scmp.ne.s32.totalorder %s1747_s23, %s1743_s22 }
   0x6   : > { %p155_p1 = scmp.eq.s32.totalorder %s154_s29, 0  ;;  %p168_p2 = scmp.eq.s32.totalorder %s1828_s25, 1 }
   0x7   : > { %p173_p3 = scmp.ne.s32.totalorder %s1743_s22, %s1739_s21  ;;  %p174_p4 = scmp.eq.s32.totalorder %s1389_s26, 1 }
   0x8   : > { %s1843_s30 = scalar_select %p155_p1, %s1747_s23, %s157_s28  }
   0x9   : > { %p1845_p5 = por %p168_p2, %p167_p0  ;;  %p1849_p6 = por %p174_p4, %p173_p3 }
   0xa   : > { %p1392_p7 = scmp.ge.s32.totalorder %s1751_s24, 1  ;;  %p214_p8 = scmp.lt.s32.totalorder %s1751_s24, 3 }
   0xc   : > { %p215_p9 = pnand %p1392_p7, %p214_p8 }
   0xd   : > { %p243_p10 = scmp.lt.s32.totalorder (!%p215_p9), %s1828_s25, 1  ;;  %vm249_vm0 = vcmask (!%p215_p9), 261120   ;;  %v274_v7 = vld [vmem:[%s2113_s1] sm:$0xff] (!%p215_p9)  ;;  %v275_v8 = vld [vmem:[%s2113_s1 + $0x8] sm:$0xff] (!%p215_p9)  ;;  %v276_v9 = vld [vmem:[%s2113_s1 + $0x10] sm:$0xff] (!%p215_p9)  ;;  %v1753_v10 = vmov (!%p215_p9), 0.0|0.0   ;;  %v264_v17 = vlaneseq (!%p215_p9) }
   0xe   : > { %218 = sbr.rel (%p215_p9) target bundleno = 2524 (0x9dc), region = 44  ;;  %1570 = vmatprep.subr.bf16.mxu1 (!%p215_p9), %v1753_v10  ;;  %v1571_v11 = vpack.c.bf16 (!%p215_p9), %v275_v8, %v274_v7  ;;  %v277_v12 = vld [vmem:[%s2113_s1 + $0x18] sm:$0xff] (!%p215_p9)  ;;  %vm1754_vm1 = vmmov (!%p215_p9), 0   ;;  %v1755_v13 = vmov (!%p215_p9), 0.0   ;;  %v1892_v21 = vld [vmem:[%s2117_s5] sm:$0xff] (!%p215_p9)  ;;  %s1758_s11 = smov (!%p215_p9), 88  }
   0xf   : > { %1470 = vmatprep.mubr.msk.f32.mxu1 (!%p215_p9), %vm1754_vm1, %v1755_v13  ;;  %1483 = vmatprep.subr.mxu0 (!%p215_p9), %v1755_v13  ;;  %v1574_v14 = vpack.c.bf16 (!%p215_p9), %v277_v12, %v276_v9  ;;  %v1886_v19 = vshrl.u32 (!%p215_p9), %v264_v17, 7  ;;  %s1759_s12 = smov (!%p215_p9), 80   ;;  %s1761_s14 = smov (!%p215_p9), 72   ;;  %vm360_vm2 = vcmask (!%p215_p9), 64512   ;;  %v354_v38 = vand.u32 (!%p215_p9), 127, %v264_v17 }
  0x10   : > { %1485 = vmatprep.mubr.msk.f32.mxu0 (!%p215_p9), %vm1754_vm1, %v1755_v13  ;;  %1572 = vmatpush3.bf16.msra.mxu1 (!%p215_p9), %v1571_v11  ;;  %s1762_s15 = smov (!%p215_p9), 104   ;;  %v1763_v39 = vmov (!%p215_p9), -1e+30   ;;  %s1764_s16 = smov (!%p215_p9), 64   ;;  %vm692_vm4 = vcmask (!%p215_p9), 130112   ;;  %vm863_vm5 = vcmask (!%p215_p9), 195712  }
  0x11   : > { %1573 = vmatprep.subr.bf16.mxu1 (!%p215_p9), %v1753_v10  ;;  %v266_v20 = vsub.s32 (!%p215_p9), 0, %v1886_v19  ;;  %v271_v22 = vsub.s32 (!%p215_p9), 1, %v1886_v19  ;;  %vm355_vm3 = vcmp.ge.s32.totalorder (!%p215_p9), %v1886_v19, %v354_v38  ;;  %s1765_s17 = smov (!%p215_p9), 48   ;;  %s1766_s18 = smov (!%p215_p9), 40   ;;  %vm1034_vm6 = vcmask (!%p215_p9), 261312  }
  0x12   : > { %v356_v40 = vsel (!%p215_p9), %vm355_vm3, 0.0, %v1763_v39  ;;  %s1767_s19 = smov (!%p215_p9), 56   ;;  %v1039_v39 = vld [vmem:[%s2114_s2 + $0x10] sm:$0xff] (!%p215_p9)  ;;  %s1771_s20 = smov (!%p215_p9), [#allocation3]  }
  0x13   : > { %v267_v23 = vrot.slane (!%p215_p9), %v1892_v21, %v266_v20  ;;  %v272_v26 = vrot.slane (!%p215_p9), %v1892_v21, %v271_v22  ;;  %s1693_s26 = sshll.u32 (!%p215_p9), %s1771_s20, 4  ;;  %s1694_s26 = int_to_ptr.vmem [resolvable:$false] %s1693_s26 }
  0x14   : > { %1575 = vmatpush3.bf16.msra.mxu1 (!%p215_p9), %v1574_v14  ;;  %s1695_s28 = scalar_lea.vmem (!%p215_p9), %s1694_s26, 256 }
  0x15   : > { %s244_s9 = scalar_select %p243_p10, %s1828_s25, 1  ;;  %1473 = vmatprep.subr.mxu1 %v1755_v13 }
  0x17   : > { %s1394_s10 = sshll.u32 %s244_s9, 3  ;;  %s1756_s9 = smov 120  }
  0x18   : > { %s246_s13 = scalar_lea.vmem %s2112_s0, %s1394_s10  ;;  %s1757_s10 = smov 96  }
  0x19   : > { %v1860_v0 = vld [vmem:[%s246_s13] sm:$0xff]  ;;  %s1760_s13 = smov 112  }
  0x1a   : > { %v250_v1 = vsel %vm249_vm0, %v1860_v0, 0.0 }
  0x1b   : > { %251 = vadd.xlane.f32.xlu0 %v250_v1 }
  0xa8   : > { %v252_v2 = vpop.xlane.xlu0 %251 }
  0xa9   : > { %v254_v3 = vmul.f32 0.03125, %v252_v2 }
  0xab   : > { %v255_v4 = vsub.f32 %v1860_v0, %v254_v3 }
  0xad   : > { %v256_v5 = vmul.f32 %v255_v4, %v255_v4 }
  0xaf   : > { %v257_v6 = vsel %vm249_vm0, %v256_v5, 0.0 }
  0xb0   : > { %258 = vadd.xlane.f32.xlu0 %v257_v6 }
 0x13d   : > { %v259_v15 = vpop.xlane.xlu0 %258 }
 0x13e   : > { %v260_v16 = vmul.f32 0.03125, %v259_v15 }
 0x140   : > { %v261_v18 = vadd.f32 1e-05, %v260_v16 }
 0x142   : > { %1669 = vrsqrt.f32 %v261_v18 }
 0x14c   : > { %v1670_v24 = vpop.eup %1669 }
 0x14d   : > { %v263_v25 = vmul.f32 %v1670_v24, %v255_v4 }
 0x14f   : > { %v268_v27 = vmul.f32 %v267_v23, %v263_v25 }
 0x151   : > { %v273_v28 = vadd.f32 %v272_v26, %v268_v27 }
 0x153   : > { %1471 = vmatmul.mubr.msk.f32.vlgmr.msra.gmra.mrb[0].mxu1 %vm249_vm0, %v273_v28 }
 0x154   : > { %1475 = vmatprep.mubr.msk.f32.mxu1 %vm1754_vm1, %v1755_v13 }
 0x226   : > { %v1900_v29 = vpop.f32.mrb[0].mxu1 }
 0x227   : > { %523 = vrot.lane.b32.xlu0 %v1900_v29, %s1756_s9  ;;  %358 = vrot.lane.b32.xlu1 %v1900_v29, %s1757_s10  ;;  %v1472_v30 = vpop.f32.mrb[1].mxu1 }
 0x22b   : > { %525 = vrot.lane.b32.xlu1 %v1900_v29, %s1758_s11  ;;  %s240_s11 = sand.u32 1, %s1743_s22  }
 0x22f   : > { %696 = vrot.lane.b32.xlu1 %v1900_v29, %s1759_s12  ;;  %s1393_s12 = sshll.u32 %s240_s11, 3 }
 0x233   : > { %694 = vrot.lane.b32.xlu1 %v1900_v29, %s1760_s13  ;;  %s1768_s13 = smov 8  }
 0x237   : > { %867 = vrot.lane.b32.xlu1 %v1900_v29, %s1761_s14  ;;  %s1769_s14 = smov 16  }
 0x23b   : > { %865 = vrot.lane.b32.xlu1 %v1900_v29, %s1762_s15  ;;  %s1770_s15 = smov 24  }
 0x299   : > { %v359_v31 = vpop.permute.xlu1 %358  ;;  %v524_v33 = vpop.permute.xlu0 %523 }
 0x29a   : > { %1474 = vmatpush3.xpose.msk.msra.mxu1 %vm360_vm2, %v359_v31 }
 0x29b   : > { %1478 = vmatprep.subr.mxu1 %v1755_v13 }
 0x29d   : > { %1476 = vmatmul.mubr.msk.f32.vlgmr.msra.gmra.mrb[2].mxu1 %vm360_vm2, %v1900_v29  ;;  %v526_v32 = vpop.permute.xlu1 %525 }
 0x29e   : > { %1484 = vmatpush3.xpose.msk.msra.mxu0 %vm360_vm2, %v526_v32  ;;  %1480 = vmatprep.mubr.msk.f32.mxu1 %vm1754_vm1, %v1755_v13 }
 0x29f   : > { %1493 = vmatprep.subr.mxu0 %v1755_v13 }
 0x2a1   : > { %1486 = vmatmul.mubr.msk.f32.vlgmr.msra.gmra.mrb[0].mxu0 %vm360_vm2, %v524_v33  ;;  %v697_v34 = vpop.permute.xlu1 %696 }
 0x2a2   : > { %1494 = vmatpush3.xpose.msk.msra.mxu0 %vm360_vm2, %v697_v34  ;;  %1495 = vmatprep.mubr.msk.f32.mxu0 %vm1754_vm1, %v1755_v13 }
 0x2a3   : > { %1503 = vmatprep.subr.mxu0 %v1755_v13 }
 0x2a5   : > { %v695_v35 = vpop.permute.xlu1 %694 }
 0x2a6   : > { %1496 = vmatmul.mubr.msk.f32.vlgmr.msra.gmra.mrb[2].mxu0 %vm360_vm2, %v695_v35 }
 0x2a7   : > { %1505 = vmatprep.mubr.msk.f32.mxu0 %vm1754_vm1, %v1755_v13 }
 0x2a9   : > { %v868_v36 = vpop.permute.xlu1 %867 }
 0x2aa   : > { %1504 = vmatpush3.xpose.msk.msra.mxu0 %vm360_vm2, %v868_v36  ;;  %v1037_v36 = vld [vmem:[%s2114_s2] sm:$0xff] }
 0x2ab   : > { %1588 = vmatprep.subr.bf16.mxu0 %v1753_v10 }
 0x2ad   : > { %v866_v37 = vpop.permute.xlu1 %865 }
 0x2ae   : > { %1506 = vmatmul.mubr.msk.f32.vlgmr.msra.gmra.mrb[4].mxu0 %vm360_vm2, %v866_v37  ;;  %v1038_v37 = vld [vmem:[%s2114_s2 + $0x8] sm:$0xff] }
 0x2af   : > { %1567 = vmatprep.mubr.msk.f32.mxu0 %vm1754_vm1, %v1755_v13  ;;  %v1577_v38 = vpack.c.bf16 %v1038_v37, %v1037_v36 }
 0x370   : > { %v431_v41 = vpop.f32.mrb[2].mxu1 }
 0x371   : > { %v432_v42 = vadd.f32 %v431_v41, %v356_v40  ;;  %v1477_v43 = vpop.f32.mrb[3].mxu1 }
 0x373   : > { %v435_v44 = vsel %vm360_vm2, %v432_v42, -inf }
 0x374   : > { %v597_v45 = vpop.f32.mrb[0].mxu0  ;;  %436 = vmax.xlane.f32.xlu1 %v435_v44 }
 0x375   : > { %v598_v46 = vadd.f32 %v597_v45, %v356_v40  ;;  %v1487_v47 = vpop.f32.mrb[1].mxu0 }
 0x377   : > { %v601_v48 = vsel %vm360_vm2, %v598_v46, -inf }
 0x378   : > { %602 = vmax.xlane.f32.xlu0 %v601_v48 }
 0x379   : > { %v768_v49 = vpop.f32.mrb[2].mxu0 }
 0x37a   : > { %v769_v50 = vadd.f32 %v768_v49, %v356_v40  ;;  %v1497_v51 = vpop.f32.mrb[3].mxu0 }
 0x37c   : > { %v772_v52 = vsel %vm360_vm2, %v769_v50, -inf }
 0x37d   : > { %773 = vmax.xlane.f32.xlu1 %v772_v52  ;;  %v1043_v52 = vsub.s32 4, %v1886_v19 }
 0x381   : > { %v939_v53 = vpop.f32.mrb[4].mxu0 }
 0x382   : > { %v940_v54 = vadd.f32 %v939_v53, %v356_v40  ;;  %v1507_v55 = vpop.f32.mrb[5].mxu0  ;;  %v1040_v40 = vld [vmem:[%s2114_s2 + $0x18] sm:$0xff]  ;;  %v1044_v53 = vrot.slane %v1892_v21, %v1043_v52 }
 0x383   : > { %v1580_v41 = vpack.c.bf16 %v1040_v40, %v1039_v39 }
 0x384   : > { %v943_v56 = vsel %vm360_vm2, %v940_v54, -inf }
 0x385   : > { %944 = vmax.xlane.f32.xlu0 %v943_v56 }
 0x38e   : > { %446 = vrot.lane.b32.xlu1 %v1900_v29, %s1764_s16 }
 0x401   : > { %v437_v57 = vpop.xlane.xlu1 %436 }
 0x402   : > { %v438_v58 = vsub.f32 %v432_v42, %v437_v57 }
 0x404   : > { %v439_v59 = vmul.f32 1.442695, %v438_v58 }
 0x405   : > { %v603_v60 = vpop.xlane.xlu0 %602 }
 0x406   : > { %1671 = vpow2.f32 %v439_v59  ;;  %v604_v61 = vsub.f32 %v598_v46, %v603_v60 }
 0x408   : > { %v605_v62 = vmul.f32 1.442695, %v604_v61 }
 0x40a   : > { %1673 = vpow2.f32 %v605_v62  ;;  %v774_v63 = vpop.xlane.xlu1 %773 }
 0x40b   : > { %v775_v1 = vsub.f32 %v769_v50, %v774_v63  ;;  %v1142_v63 = vld [vmem:[%s2115_s3] sm:$0xff] }
 0x40d   : > { %v776_v2 = vmul.f32 1.442695, %v775_v1 }
 0x40e   : > { %v447_v3 = vpop.permute.xlu1 %446 }
 0x40f   : > { %1675 = vpow2.f32 %v776_v2  ;;  %1479 = vmatpush3.msra.mxu1 %v447_v3  ;;  %v1144_v2 = vld [vmem:[%s2115_s3 + $0x10] sm:$0xff]  ;;  %v1145_v3 = vld [vmem:[%s2115_s3 + $0x18] sm:$0xff] }
 0x410   : > { %v1672_v4 = vpop.eup %1671  ;;  %1488 = vmatprep.subr.mxu1 %v1755_v13 }
 0x411   : > { %v441_v5 = vsel %vm360_vm2, %v1672_v4, 0.0 }
 0x412   : > { %v945_v6 = vpop.xlane.xlu0 %944  ;;  %442 = vadd.xlane.f32.xlu1 %v441_v5  ;;  %v1224_v5 = vld [vmem:[%s2116_s4] sm:$0xff] }
 0x413   : > { %v946_v7 = vsub.f32 %v940_v54, %v945_v6  ;;  %v1225_v6 = vld [vmem:[%s2116_s4 + $0x8] sm:$0xff] }
 0x414   : > { %v1674_v8 = vpop.eup %1673 }
 0x415   : > { %v947_v9 = vmul.f32 1.442695, %v946_v7  ;;  %v607_v11 = vsel %vm360_vm2, %v1674_v8, 0.0  ;;  %v1226_v7 = vld [vmem:[%s2116_s4 + $0x10] sm:$0xff] }
 0x416   : > { %608 = vadd.xlane.f32.xlu0 %v607_v11 }
 0x417   : > { %1677 = vpow2.f32 %v947_v9  ;;  %v1227_v9 = vld [vmem:[%s2116_s4 + $0x18] sm:$0xff] }
 0x418   : > { %v1592_v11 = vpack.c.bf16 %v1227_v9, %v1226_v7 }
 0x419   : > { %v1676_v12 = vpop.eup %1675 }
 0x41a   : > { %v778_v14 = vsel %vm360_vm2, %v1676_v12, 0.0 }
 0x41b   : > { %779 = vadd.xlane.f32.xlu1 %v778_v14  ;;  %v1229_v14 = vld [vmem:[%s2116_s4 + $0x28] sm:$0xff] }
 0x421   : > { %v1678_v15 = vpop.eup %1677 }
 0x422   : > { %v949_v16 = vsel %vm360_vm2, %v1678_v15, 0.0 }
 0x423   : > { %950 = vadd.xlane.f32.xlu0 %v949_v16  ;;  %v1230_v16 = vld [vmem:[%s2116_s4 + $0x30] sm:$0xff] }
 0x42c   : > { %783 = vrot.lane.b32.xlu1 %v1900_v29, %s1765_s17 }
 0x430   : > { %954 = vrot.lane.b32.xlu1 %v1900_v29, %s1766_s18 }
 0x439   : > { %612 = vrot.lane.b32.xlu0 %v1900_v29, %s1767_s19  ;;  %s1317_s19 = scalar_lea.sflag [#allocation4], %s240_s11 }
 0x49f   : > { %v443_v17 = vpop.xlane.xlu1 %442 }
 0x4a0   : > { %1679 = vrcp.f32 %v443_v17  ;;  %v1231_v17 = vld [vmem:[%s2116_s4 + $0x38] sm:$0xff] }
 0x4a3   : > { %v609_v18 = vpop.xlane.xlu0 %608 }
 0x4a4   : > { %1681 = vrcp.f32 %v609_v18  ;;  %v1598_v18 = vpack.c.bf16 %v1231_v17, %v1230_v16 }
 0x4a8   : > { %v780_v20 = vpop.xlane.xlu1 %779 }
 0x4a9   : > { %1683 = vrcp.f32 %v780_v20  ;;  %v1232_v20 = vld [vmem:[%s2116_s4 + $0x40] sm:$0xff] }
 0x4aa   : > { %v1680_v22 = vpop.eup %1679 }
 0x4ab   : > { %v445_v23 = vmul.f32 %v1680_v22, %v1672_v4  ;;  %v1586_v4 = vpack.c.bf16 %v1145_v3, %v1144_v2  ;;  %v1233_v22 = vld [vmem:[%s2116_s4 + $0x48] sm:$0xff] }
 0x4ac   : > { %v784_v27 = vpop.permute.xlu1 %783 }
 0x4ad   : > { %1481 = vmatmul.mubr.msk.f32.vlgmr.msra.gmra.mrb[4].mxu1 %vm360_vm2, %v445_v23  ;;  %v1601_v23 = vpack.c.bf16 %v1233_v22, %v1232_v20 }
 0x4ae   : > { %1490 = vmatprep.mubr.msk.f32.mxu1 %vm1754_vm1, %v1755_v13  ;;  %v1682_v25 = vpop.eup %1681 }
 0x4af   : > { %v611_v26 = vmul.f32 %v1682_v25, %v1674_v8  ;;  %v1589_v8 = vpack.c.bf16 %v1225_v6, %v1224_v5  ;;  %v1235_v25 = vld [vmem:[%s2116_s4 + $0x58] sm:$0xff] }
 0x4b0   : > { %v951_v24 = vpop.xlane.xlu0 %950  ;;  %v955_v31 = vpop.permute.xlu1 %954 }
 0x4b1   : > { %1685 = vrcp.f32 %v951_v24  ;;  %1590 = vmatpush3.bf16.msra.mxu0 %v1589_v8  ;;  %v1234_v24 = vld [vmem:[%s2116_s4 + $0x50] sm:$0xff] }
 0x4b2   : > { %1591 = vmatprep.subr.bf16.mxu0 %v1753_v10 }
 0x4b3   : > { %v1684_v29 = vpop.eup %1683 }
 0x4b4   : > { %v613_v28 = vpop.permute.xlu0 %612  ;;  %v782_v30 = vmul.f32 %v1684_v29, %v1676_v12  ;;  %v1228_v12 = vld [vmem:[%s2116_s4 + $0x20] sm:$0xff] }
 0x4b5   : > { %1489 = vmatpush3.msra.mxu1 %v613_v28  ;;  %1593 = vmatpush3.bf16.msra.mxu0 %v1592_v11  ;;  %v1237_v28 = vld [vmem:[%s2116_s4 + $0x68] sm:$0xff] }
 0x4b6   : > { %1491 = vmatmul.mubr.msk.f32.vlgmr.msra.gmra.mrb[6].mxu1 %vm360_vm2, %v611_v26  ;;  %1498 = vmatprep.subr.mxu1 %v1755_v13  ;;  %v1604_v26 = vpack.c.bf16 %v1235_v25, %v1234_v24 }
 0x4b7   : > { %1499 = vmatpush3.msra.mxu1 %v784_v27  ;;  %1500 = vmatprep.mubr.msk.f32.mxu1 %vm1754_vm1, %v1755_v13  ;;  %v1236_v27 = vld [vmem:[%s2116_s4 + $0x60] sm:$0xff] }
 0x4b8   : > { %1508 = vmatprep.subr.mxu1 %v1755_v13  ;;  %1594 = vmatprep.subr.bf16.mxu0 %v1753_v10  ;;  %v1607_v29 = vpack.c.bf16 %v1237_v28, %v1236_v27 }
 0x4ba   : > { %1501 = vmatmul.mubr.msk.f32.vlgmr.msra.gmra.mrb[8].mxu1 %vm360_vm2, %v782_v30 }
 0x4bb   : > { %v1686_v32 = vpop.eup %1685  ;;  %1509 = vmatpush3.msra.mxu1 %v955_v31  ;;  %1510 = vmatprep.mubr.msk.f32.mxu1 %vm1754_vm1, %v1755_v13 }
 0x4bc   : > { %v953_v33 = vmul.f32 %v1686_v32, %v1678_v15  ;;  %1576 = vmatprep.subr.bf16.mxu1 %v1753_v10  ;;  %v1595_v15 = vpack.c.bf16 %v1229_v14, %v1228_v12 }
 0x4be   : > { %1511 = vmatmul.mubr.msk.f32.vlgmr.msra.gmra.mrb[10].mxu1 %vm360_vm2, %v953_v33  ;;  %1596 = vmatpush3.bf16.msra.mxu0 %v1595_v15  ;;  %v1134_v33 = vsub.s32 2, %v1886_v19 }
 0x4bf   : > { %1521 = vmatprep.mubr.msk.f32.mxu1 %vm1754_vm1, %v1755_v13  ;;  %1578 = vmatpush3.bf16.msra.mxu1 %v1577_v38 }
 0x4c0   : > { %1579 = vmatprep.subr.bf16.mxu1 %v1753_v10  ;;  %1597 = vmatprep.subr.bf16.mxu0 %v1753_v10 }
 0x4c2   : > { %1599 = vmatpush3.bf16.msra.mxu0 %v1598_v18 }
 0x4c3   : > { %1581 = vmatpush3.bf16.msra.mxu1 %v1580_v41  ;;  %1600 = vmatprep.subr.bf16.mxu0 %v1753_v10  ;;  %v1239_v41 = vld [vmem:[%s2116_s4 + $0x78] sm:$0xff] }
 0x4c4   : > { %1582 = vmatprep.subr.bf16.mxu1 %v1753_v10 }
 0x4c6   : > { %1602 = vmatpush3.bf16.msra.mxu0 %v1601_v23 }
 0x4c7   : > { %1603 = vmatprep.subr.bf16.mxu0 %v1753_v10 }
 0x4ca   : > { %1605 = vmatpush3.bf16.msra.mxu0 %v1604_v26 }
 0x4cb   : > { %1606 = vmatprep.subr.bf16.mxu0 %v1753_v10 }
 0x4ce   : > { %1608 = vmatpush3.bf16.msra.mxu0 %v1607_v29 }
 0x4cf   : > { %1609 = vmatprep.subr.bf16.mxu0 %v1753_v10 }
 0x580   : > { %v518_v34 = vpop.f32.mrb[4].mxu1 }
 0x581   : > { %522 = vst.msk [vmem:[#allocation2] sm:$0xff] %vm360_vm2, %v518_v34  ;;  %v1482_v35 = vpop.f32.mrb[5].mxu1  ;;  %v1139_v34 = vsub.s32 3, %v1886_v19 }
 0x582   : > { %v1135_v35 = vrot.slane %v1892_v21, %v1134_v33 }
 0x583   : > { %v1140_v38 = vrot.slane %v1892_v21, %v1139_v34 }
 0x589   : > { %v684_v42 = vpop.f32.mrb[6].mxu1 }
 0x58a   : > { %689 = vrot.lane.b32.xlu0 %v684_v42, %s1768_s13  ;;  %v1492_v43 = vpop.f32.mrb[7].mxu1  ;;  %s1411_s13 = sshll.u32 %s1828_s25, 7 }
 0x58b   : > { %v1148_v43 = vsub.s32 6, %v1886_v19  ;;  %s2069_s18 = scalar_lea.hbm %s2118_s6, %s1411_s13 }
 0x58d   : > { %v855_v44 = vpop.f32.mrb[8].mxu1 }
 0x58e   : > { %860 = vrot.lane.b32.xlu1 %v855_v44, %s1769_s14  ;;  %v1502_v45 = vpop.f32.mrb[9].mxu1  ;;  %v1149_v44 = vrot.slane %v1892_v21, %v1148_v43  ;;  %s242_s14 = scalar_lea.vmem [#allocation3], %s1393_s12 }
 0x591   : > { %v1026_v46 = vpop.f32.mrb[10].mxu1 }
 0x592   : > { %1031 = vrot.lane.b32.xlu0 %v1026_v46, %s1770_s15  ;;  %v1512_v47 = vpop.f32.mrb[11].mxu1  ;;  %s1330_s15 = sshll.u32 %s242_s14, 4  ;;  %s2071_s15 = int_to_ptr.vmem [resolvable:$true] %s1330_s15 }
 0x593   : > { %s1689_s25 = scalar_lea.vmem %s2071_s15, 128  ;;  %p1696_p0 = scmp.lt.s32.totalorder %s2071_s15, %s1694_s26 }
 0x594   : > { %p1690_p11 = scmp.ne.s32.totalorder %s2071_s15, %s1689_s25  ;;  %p1697_p1 = scmp.lt.s32.totalorder %s1695_s28, %s1689_s25 }
 0x596   : > { %p1691_p12 = pnand %p1690_p11, %p1845_p5  ;;  %p1698_p2 = por %p1697_p1, %p1696_p0 }
 0x598   : > { %p1692_p13 = pneg %p1691_p12 }
 0x59a   : > { %p1699_p3 = pnand %p1698_p2, %p1692_p13 }
 0x5fc   : > { %v690_v48 = vpop.permute.xlu0 %689 }
 0x5fd   : > { %693 = vst.msk [vmem:[#allocation2] sm:$0xff] %vm692_vm4, %v690_v48 }
 0x600   : > { %v861_v49 = vpop.permute.xlu1 %860 }
 0x601   : > { %864 = vst.msk [vmem:[#allocation2] sm:$0xff] %vm863_vm5, %v861_v49  ;;  %v1242_v49 = vsub.s32 5, %v1886_v19 }
 0x604   : > { %v1032_v50 = vpop.permute.xlu0 %1031 }
 0x605   : > { %1035 = vst.msk [vmem:[#allocation2] sm:$0xff] %vm1034_vm6, %v1032_v50  ;;  %v1243_v50 = vrot.slane %v1892_v21, %v1242_v49 }
 0x60c   : > { %v1036_v51 = vld [vmem:[#allocation2] sm:$0xff] }
 0x60d   : > { %1522 = vmatmul.mubr.msk.f32.vlgmr.msra.gmra.mrb[12].mxu1 %vm249_vm0, %v1036_v51 }
 0x60e   : > { %1532 = vmatprep.mubr.msk.f32.mxu1 %vm1754_vm1, %v1755_v13 }
 0x6e0   : > { %v1114_v54 = vpop.f32.mrb[12].mxu1 }
 0x6e1   : > { %v1115_v55 = vadd.f32 %v1114_v54, %v1044_v53  ;;  %v1523_v56 = vpop.f32.mrb[13].mxu1 }
 0x6e3   : > { %v1980_v57 = vadd.f32 %v1115_v55, %v1860_v0  ;;  %v1143_v0 = vld [vmem:[%s2115_s3 + $0x8] sm:$0xff] }
 0x6e4   : > { %v1583_v1 = vpack.c.bf16 %v1143_v0, %v1142_v63 }
 0x6e5   : > { %v1119_v58 = vsel %vm249_vm0, %v1980_v57, 0.0 }
 0x6e6   : > { %1120 = vadd.xlane.f32.xlu1 %v1119_v58  ;;  %1584 = vmatpush3.bf16.msra.mxu1 %v1583_v1 }
 0x6e7   : > { %1585 = vmatprep.subr.bf16.mxu1 %v1753_v10  ;;  %v1238_v10 = vld [vmem:[%s2116_s4 + $0x70] sm:$0xff] }
 0x6e8   : > { %v1610_v42 = vpack.c.bf16 %v1239_v41, %v1238_v10 }
 0x6ea   : > { %1587 = vmatpush3.bf16.msra.mxu1 %v1586_v4  ;;  %1611 = vmatpush3.bf16.msra.mxu0 %v1610_v42 }
 0x773   : > { %v1121_v59 = vpop.xlane.xlu1 %1120 }
 0x774   : > { %v1122_v60 = vmul.f32 0.03125, %v1121_v59 }
 0x776   : > { %v1123_v61 = vsub.f32 %v1980_v57, %v1122_v60 }
 0x778   : > { %v1124_v62 = vmul.f32 %v1123_v61, %v1123_v61 }
 0x77a   : > { %v1125_v13 = vsel %vm249_vm0, %v1124_v62, 0.0 }
 0x77b   : > { %1126 = vadd.xlane.f32.xlu0 %v1125_v13 }
 0x808   : > { %v1127_v30 = vpop.xlane.xlu0 %1126 }
 0x809   : > { %v1128_v31 = vmul.f32 0.03125, %v1127_v30 }
 0x80b   : > { %v1129_v32 = vadd.f32 1e-05, %v1128_v31 }
 0x80d   : > { %1687 = vrsqrt.f32 %v1129_v32 }
 0x817   : > { %v1688_v36 = vpop.eup %1687 }
 0x818   : > { %v1131_v37 = vmul.f32 %v1688_v36, %v1123_v61 }
 0x81a   : > { %v1136_v39 = vmul.f32 %v1135_v35, %v1131_v37 }
 0x81c   : > { %v1141_v40 = vadd.f32 %v1140_v38, %v1136_v39 }
 0x81e   : > { %1533 = vmatmul.mubr.msk.f32.vlgmr.msra.gmra.mrb[14].mxu1 %vm249_vm0, %v1141_v40 }
 0x8f1   : > { %v1219_v45 = vpop.f32.mrb[14].mxu1 }
 0x8f2   : > { %v1220_v46 = vadd.f32 %v1219_v45, %v1149_v44  ;;  %v1534_v47 = vpop.f32.mrb[15].mxu1 }
 0x8f4   : > { %v1223_v48 = vmax.f32 %v1220_v46, 0.0 }
 0x8f6   : > { %1568 = vmatmul.mubr.f32.vlgmr.msra.gmra.mrb[6].mxu0 %v1223_v48 }
 0x9c9   : > { %v1310_v51 = vpop.f32.mrb[6].mxu0 }
 0x9ca   : > { %v1311_v52 = vadd.f32 %v1310_v51, %v1243_v50  ;;  %v1569_v53 = vpop.f32.mrb[7].mxu0 }
 0x9cc   : > { %v1314_v54 = vadd.f32 %v1311_v52, %v1980_v57 }
 0x9ce   : > { %1315 = vst.msk [vmem:[%s242_s14] sm:$0xff] %vm249_vm0, %v1314_v54 }
 0x9cf   : > { %1702 = shalt.err (!%p1699_p3)
}
 0x9d0   : > { %s1703_s29 = scalar_lea.hbm %s2069_s18, 128  ;;  %s1707_s11 = scalar_lea.hbm %s2118_s6, 256 }
 0x9d1   : > { %p1704_p4 = scmp.ne.s32.totalorder %s2069_s18, %s1703_s29  ;;  %p1708_p9 = scmp.lt.u32.totalorder %s2069_s18, %s2118_s6 }
 0x9d2   : > { %p1709_p10 = scmp.lt.u32.totalorder %s1707_s11, %s1703_s29  ;;  %p1711_p12 = scmp.lt.u32.totalorder %s1703_s29, %s2069_s18 }
 0x9d3   : > { %p1705_p7 = pnand %p1704_p4, %p1845_p5 }
 0x9d4   : > { %p1710_p11 = por %p1709_p10, %p1708_p9 }
 0x9d5   : > { %p1706_p8 = pneg %p1705_p7 }
 0x9d6   : > { %p1712_p13 = por %p1711_p12, %p1710_p11 }
 0x9d8   : > { %p1713_p0 = pnand %p1712_p13, %p1706_p8 }
 0x9da   : > { %1716 = shalt.err (!%p1713_p0)
}
 0x9db   : > { %1612 = dma.vmem_to_hbm [thread:$0]  (%p1845_p5), %s2071_s15, 128, %s2069_s18, %s1317_s19  }
 0x9dc PF: > { %p1618_p1 = scmp.ge.s32.totalorder %s1751_s24, 2  ;;  %s1342_s14 = sand.u32 1, %s1739_s21  }
 0x9dd   : > { %s1343_s16 = scalar_lea.sflag [#allocation4], %s1342_s14 }
 0x9de   : > { %p1615_p2 = pnand %p1618_p1, %p1849_p6 }
 0x9e0   : > { %1734 = dma.done.wait (!%p1615_p2), %s1343_s16, 128  }
 0x9e1   : > { %1736 = vsyncadd (!%p1615_p2), %s1343_s16, 4294967168  ;;  %p16_p3 = scmp.ge.s32.totalorder %s1832_s27, 4   ;;  %s2121_s21 = smov %s1743_s22 }
 0x9e2   : > { %s2122_s22 = smov %s1747_s23  ;;  %s2123_s23 = smov %s1843_s30 }
 0x9e3   : > { %s2124_s24 = smov %s1832_s27  ;;  %18 = sbr.rel (!%p16_p3) target bundleno = 3 (0x3), region = 79 }
 0x9ea   :  { %1348 = vsyncpa [#allocation4], 1 }
 0x9eb   :  { %1350 = vsyncpa [#allocation4 + $0x1], 1 }

</bundles_post_ra>
